<compile_context>
chip_gen: v7x
topology: tpu7x:2x2x1
jax: 0.10.0
libtpu: 0.0.40
codegen_flags: <defaults>
</compile_context>

<pallas_src>
import math

import jax
import jax.numpy as jnp
from jax.experimental import pallas as pl
from jax.experimental.pallas import tpu as pltpu


def _round_up(x, m):
    return ((x + m - 1) // m) * m


def _pick_tm(M, matmul_dtype):
    # 256 rows fills the MXU on v6e/v7x and amortizes per-grid-step overhead;
    # clamp to the sublane-rounded problem size for small inputs.
    mult = 16 if matmul_dtype == jnp.bfloat16 else 8
    return min(256, _round_up(M, mult))


def _pick_tk(mlp_dim):
    # Chunk the hidden (mlp) dimension so the W1/W2 blocks stay VMEM-friendly
    # on v7x (64 MiB).  Only exact divisors are used so no K-padding garbage
    # can leak into the accumulator.
    if mlp_dim <= 2048:
        return mlp_dim
    for tk in (2048, 1024, 512, 256, 128):
        if mlp_dim % tk == 0:
            return tk
    return mlp_dim


def _vmem_limit_bytes():
    # ~3/4 of physical VMEM (96 MiB on v5e/v6e, 48 MiB on v7x).
    try:
        cap = pltpu.get_tpu_info().vmem_capacity_bytes
    except Exception:
        cap = 128 * 1024 * 1024
    return int(cap * 3 // 4)


_INV_SQRT2 = 1.0 / math.sqrt(2.0)


def _gelu_exact(h):
    # Exact GELU (matches torch.nn.functional.gelu default, erf-based).
    # erf lowers to the EUP slot and overlaps with MXU work essentially free.
    return 0.5 * h * (1.0 + jax.lax.erf(h * _INV_SQRT2))


def mlp_block_kernel_single(x_ref, w1_ref, b1_ref, w2_ref, b2_ref, o_ref):
    # Single pass over the full mlp_dim (num_k == 1): no scratch accumulator.
    # x_ref:  (tm, emb_dim) bf16   w1_ref: (emb_dim, mlp_dim) bf16
    # b1_ref: (1, mlp_dim)  f32    w2_ref: (mlp_dim, emb_dim) bf16
    # b2_ref: (1, emb_dim)  f32    o_ref:  (tm, emb_dim)
    h = jnp.dot(x_ref[...], w1_ref[...], preferred_element_type=jnp.float32)
    h = _gelu_exact(h + b1_ref[...])
    # drop1: identity in eval mode.
    y = jnp.dot(h.astype(w2_ref.dtype), w2_ref[...],
                preferred_element_type=jnp.float32)
    # drop2: identity in eval mode.
    o_ref[...] = (y + b2_ref[...]).astype(o_ref.dtype)


def mlp_block_kernel_chunked(x_ref, w1_ref, b1_ref, w2_ref, b2_ref, o_ref,
                             acc_ref):
    # mlp_dim split into chunks of tk along grid axis 1 (reduction axis).
    # acc_ref: (tm, emb_dim) f32 accumulator for dense2 partial products.
    k = pl.program_id(1)

    @pl.when(k == 0)
    def _init():
        acc_ref[...] = jnp.zeros_like(acc_ref)

    h = jnp.dot(x_ref[...], w1_ref[...], preferred_element_type=jnp.float32)
    h = _gelu_exact(h + b1_ref[...])
    # drop1: identity in eval mode.
    acc_ref[...] += jnp.dot(h.astype(w2_ref.dtype), w2_ref[...],
                            preferred_element_type=jnp.float32)

    @pl.when(k == pl.num_programs(1) - 1)
    def _finalize():
        # drop2: identity in eval mode.
        o_ref[...] = (acc_ref[...] + b2_ref[...]).astype(o_ref.dtype)


def mlp_block(x, w1, b1, w2, b2, *, tm=None, tk=None,
              matmul_dtype=jnp.bfloat16):
    """Fused MLP block forward.

    x:  (batch, seq, emb_dim)
    w1: (emb_dim, mlp_dim), b1: (mlp_dim,)
    w2: (mlp_dim, emb_dim), b2: (emb_dim,)
    Returns (batch, seq, emb_dim) in x.dtype.
    """
    batch, seq, emb_dim = x.shape
    mlp_dim = w1.shape[1]
    M = batch * seq

    if tm is None:
        tm = _pick_tm(M, matmul_dtype)
    if tk is None:
        tk = _pick_tk(mlp_dim)
    if mlp_dim % tk != 0:
        raise ValueError("tk must divide mlp_dim (padding the reduction axis "
                         "would corrupt the accumulator)")

    # Last M block may be padded; garbage rows only ever reach padded
    # (discarded) output rows, never the accumulator of valid rows.
    num_m = pl.cdiv(M, tm)
    num_k = mlp_dim // tk

    # Cast MXU inputs once in the wrapper: halves x / weight HBM bytes and
    # removes a per-iteration in-kernel VPU cast.
    x2d = x.reshape(M, emb_dim).astype(matmul_dtype)
    w1m = w1.astype(matmul_dtype)
    w2m = w2.astype(matmul_dtype)
    # Biases stay in f32; they are applied after the f32 accumulation.
    b1_2d = b1.reshape(1, mlp_dim).astype(jnp.float32)
    b2_2d = b2.reshape(1, emb_dim).astype(jnp.float32)

    compiler_params_common = dict(vmem_limit_bytes=_vmem_limit_bytes())

    # NOTE: for emb_dim < 128 (tiny demo shape) output stores are lane-masked;
    # realistic emb_dim (multiple of 128) is lane-dense.
    if num_k == 1:
        grid_spec = pltpu.PrefetchScalarGridSpec(
            num_scalar_prefetch=0,
            grid=(num_m,),
            in_specs=[
                pl.BlockSpec((tm, emb_dim), lambda i: (i, 0)),      # x rows
                pl.BlockSpec((emb_dim, mlp_dim), lambda i: (0, 0)),  # W1
                pl.BlockSpec((1, mlp_dim), lambda i: (0, 0)),        # b1
                pl.BlockSpec((mlp_dim, emb_dim), lambda i: (0, 0)),  # W2
                pl.BlockSpec((1, emb_dim), lambda i: (0, 0)),        # b2
            ],
            out_specs=pl.BlockSpec((tm, emb_dim), lambda i: (i, 0)),
        )
        kernel = mlp_block_kernel_single
        dim_sem = ("parallel",)
    else:
        grid_spec = pltpu.PrefetchScalarGridSpec(
            num_scalar_prefetch=0,
            grid=(num_m, num_k),
            in_specs=[
                pl.BlockSpec((tm, emb_dim), lambda i, k: (i, 0)),     # x rows
                pl.BlockSpec((emb_dim, tk), lambda i, k: (0, k)),     # W1 chunk
                pl.BlockSpec((1, tk), lambda i, k: (0, k)),           # b1 chunk
                pl.BlockSpec((tk, emb_dim), lambda i, k: (k, 0)),     # W2 chunk
                pl.BlockSpec((1, emb_dim), lambda i, k: (0, 0)),      # b2
            ],
            out_specs=pl.BlockSpec((tm, emb_dim), lambda i, k: (i, 0)),
            scratch_shapes=[pltpu.VMEM((tm, emb_dim), jnp.float32)],
        )
        kernel = mlp_block_kernel_chunked
        dim_sem = ("parallel", "arbitrary")

    out2d = pl.pallas_call(
        kernel,
        out_shape=jax.ShapeDtypeStruct((M, emb_dim), x.dtype),
        grid_spec=grid_spec,
        compiler_params=pltpu.CompilerParams(
            dimension_semantics=dim_sem, **compiler_params_common),
    )(x2d, w1m, b1_2d, w2m, b2_2d)

    return out2d.reshape(batch, seq, emb_dim)


def init_params(key, emb_dim, mlp_dim, dtype=jnp.float32):
    """Deterministic init matching the PyTorch module's __init__:
    xavier_uniform_ on weights, normal(std=1e-6) on biases."""
    k1, k2, k3, k4 = jax.random.split(key, 4)
    # Xavier uniform bound = sqrt(6 / (fan_in + fan_out)) — symmetric in fans.
    bound1 = math.sqrt(6.0 / (emb_dim + mlp_dim))
    bound2 = math.sqrt(6.0 / (mlp_dim + emb_dim))
    w1 = jax.random.uniform(k1, (emb_dim, mlp_dim), dtype, -bound1, bound1)
    b1 = (1e-6 * jax.random.normal(k2, (mlp_dim,))).astype(dtype)
    w2 = jax.random.uniform(k3, (mlp_dim, emb_dim), dtype, -bound2, bound2)
    b2 = (1e-6 * jax.random.normal(k4, (emb_dim,))).astype(dtype)
    return w1, b1, w2, b2


if __name__ == "__main__":
    key = jax.random.PRNGKey(0)
    kx, kp = jax.random.split(key)

    batch, seq, emb_dim, mlp_dim = 2, 8, 32, 64
    x = jax.random.normal(kx, (batch, seq, emb_dim), dtype=jnp.float32)
    w1, b1, w2, b2 = init_params(kp, emb_dim, mlp_dim)

    out = mlp_block(x, w1, b1, w2, b2)
    out = jax.block_until_ready(out)

    # Reference (plain JAX) with the same bf16-matmul / f32-accumulate recipe.
    xb = x.reshape(-1, emb_dim).astype(jnp.bfloat16)
    w1b = w1.astype(jnp.bfloat16)
    w2b = w2.astype(jnp.bfloat16)
    h_ref = jnp.dot(xb, w1b, preferred_element_type=jnp.float32) + b1
    h_ref = 0.5 * h_ref * (1.0 + jax.lax.erf(h_ref / math.sqrt(2.0)))
    ref = jnp.dot(h_ref.astype(jnp.bfloat16), w2b,
                  preferred_element_type=jnp.float32) + b2
    ref = ref.reshape(batch, seq, emb_dim).astype(x.dtype)

    assert out.shape == x.shape and out.dtype == x.dtype
    assert jnp.allclose(out, ref, atol=1e-2, rtol=1e-2), "mismatch vs reference"

    print("KERNEL_OK")
</pallas_src>

<mosaic_0001>
module attributes {stable_mosaic.version = 11 : i64} {
  func.func @mlp_block_kernel_single(%arg0: i32, %arg1: memref<16x32xbf16, #tpu.memory_space<vmem>>, %arg2: memref<32x64xbf16, #tpu.memory_space<vmem>>, %arg3: memref<1x64xf32, #tpu.memory_space<vmem>>, %arg4: memref<64x32xbf16, #tpu.memory_space<vmem>>, %arg5: memref<1x32xf32, #tpu.memory_space<vmem>>, %arg6: memref<16x32xf32, #tpu.memory_space<vmem>>) attributes {dimension_semantics = [#tpu.dimension_semantics<parallel>], iteration_bounds = array<i64: 1>, scalar_prefetch = 0 : i64, scratch_operands = 0 : i64, tpu.core_type = #tpu.core_type<tc>, window_params = [{transform_indices = @transform_0, window_bounds = array<i64: 16, 32>}, {pipeline_mode = #tpu.pipeline_mode<synchronous>, transform_indices = @transform_1, window_bounds = array<i64: 32, 64>}, {pipeline_mode = #tpu.pipeline_mode<synchronous>, transform_indices = @transform_2, window_bounds = array<i64: 1, 64>}, {pipeline_mode = #tpu.pipeline_mode<synchronous>, transform_indices = @transform_3, window_bounds = array<i64: 64, 32>}, {pipeline_mode = #tpu.pipeline_mode<synchronous>, transform_indices = @transform_4, window_bounds = array<i64: 1, 32>}, {transform_indices = @transform_5, window_bounds = array<i64: 16, 32>}]} {
    %c0 = arith.constant 0 : index
    %c0_0 = arith.constant 0 : index
    %0 = vector.load %arg1[%c0, %c0_0] : memref<16x32xbf16, #tpu.memory_space<vmem>>, vector<16x32xbf16>
    %c0_1 = arith.constant 0 : index
    %c0_2 = arith.constant 0 : index
    %1 = vector.load %arg2[%c0_1, %c0_2] : memref<32x64xbf16, #tpu.memory_space<vmem>>, vector<32x64xbf16>
    %cst = arith.constant dense<0.000000e+00> : vector<16x64xf32>
    %2 = tpu.matmul %0, %1, %cst {dimension_numbers = #tpu.dot_dimension_numbers<[1], [0], [0], [1], [0, 0, 1, 1], [], []>} : vector<16x32xbf16>, vector<32x64xbf16>, vector<16x64xf32> -> vector<16x64xf32>
    %c0_3 = arith.constant 0 : index
    %c0_4 = arith.constant 0 : index
    %3 = vector.load %arg3[%c0_3, %c0_4] : memref<1x64xf32, #tpu.memory_space<vmem>>, vector<1x64xf32>
    %4 = vector.broadcast %3 : vector<1x64xf32> to vector<16x64xf32>
    %5 = arith.addf %2, %4 : vector<16x64xf32>
    %cst_5 = arith.constant 5.000000e-01 : f32
    %6 = vector.broadcast %cst_5 : f32 to vector<16x64xf32>
    %7 = arith.mulf %6, %5 : vector<16x64xf32>
    %cst_6 = arith.constant 0.707106769 : f32
    %8 = vector.broadcast %cst_6 : f32 to vector<16x64xf32>
    %9 = arith.mulf %5, %8 : vector<16x64xf32>
    %10 = math.erf %9 : vector<16x64xf32>
    %cst_7 = arith.constant 1.000000e+00 : f32
    %11 = vector.broadcast %cst_7 : f32 to vector<16x64xf32>
    %12 = arith.addf %11, %10 : vector<16x64xf32>
    %13 = arith.mulf %7, %12 : vector<16x64xf32>
    %14 = arith.truncf %13 : vector<16x64xf32> to vector<16x64xbf16>
    %c0_8 = arith.constant 0 : index
    %c0_9 = arith.constant 0 : index
    %15 = vector.load %arg4[%c0_8, %c0_9] : memref<64x32xbf16, #tpu.memory_space<vmem>>, vector<64x32xbf16>
    %cst_10 = arith.constant dense<0.000000e+00> : vector<16x32xf32>
    %16 = tpu.matmul %14, %15, %cst_10 {dimension_numbers = #tpu.dot_dimension_numbers<[1], [0], [0], [1], [0, 0, 1, 1], [], []>} : vector<16x64xbf16>, vector<64x32xbf16>, vector<16x32xf32> -> vector<16x32xf32>
    %c0_11 = arith.constant 0 : index
    %c0_12 = arith.constant 0 : index
    %17 = vector.load %arg5[%c0_11, %c0_12] : memref<1x32xf32, #tpu.memory_space<vmem>>, vector<1x32xf32>
    %18 = vector.broadcast %17 : vector<1x32xf32> to vector<16x32xf32>
    %19 = arith.addf %16, %18 : vector<16x32xf32>
    %c0_13 = arith.constant 0 : index
    %c0_14 = arith.constant 0 : index
    %20 = vector.load %arg6[%c0_13, %c0_14] : memref<16x32xf32, #tpu.memory_space<vmem>>, vector<16x32xf32>
    tpu.vector_store %arg6[%c0_13, %c0_14], %19 {strides = array<i32>} : memref<16x32xf32, #tpu.memory_space<vmem>>, vector<16x32xf32>,
    return
  }
  func.func @transform_0(%arg0: i32) -> (i32, i32) {
    %c0_i32 = arith.constant 0 : i32
    %c0_i32_0 = arith.constant 0 : i32
    return %arg0, %c0_i32 : i32, i32
  }
  func.func @transform_1(%arg0: i32) -> (i32, i32) {
    %c0_i32 = arith.constant 0 : i32
    %c0_i32_0 = arith.constant 0 : i32
    %c0_i32_1 = arith.constant 0 : i32
    return %c0_i32, %c0_i32_0 : i32, i32
  }
  func.func @transform_2(%arg0: i32) -> (i32, i32) {
    %c0_i32 = arith.constant 0 : i32
    %c0_i32_0 = arith.constant 0 : i32
    %c0_i32_1 = arith.constant 0 : i32
    return %c0_i32, %c0_i32_0 : i32, i32
  }
  func.func @transform_3(%arg0: i32) -> (i32, i32) {
    %c0_i32 = arith.constant 0 : i32
    %c0_i32_0 = arith.constant 0 : i32
    %c0_i32_1 = arith.constant 0 : i32
    return %c0_i32, %c0_i32_0 : i32, i32
  }
  func.func @transform_4(%arg0: i32) -> (i32, i32) {
    %c0_i32 = arith.constant 0 : i32
    %c0_i32_0 = arith.constant 0 : i32
    %c0_i32_1 = arith.constant 0 : i32
    return %c0_i32, %c0_i32_0 : i32, i32
  }
  func.func @transform_5(%arg0: i32) -> (i32, i32) {
    %c0_i32 = arith.constant 0 : i32
    %c0_i32_0 = arith.constant 0 : i32
    return %arg0, %c0_i32 : i32, i32
  }
}

</mosaic_0001>

<bundles_post_ra>
// kernel: tpu_custom_call.1
= control target key start
LH: loop header
LB: loop body
LE: loop exit
PB: predicated region body
PF: predicated region fallthrough
CT: control target
= control target key end

     0   :  { %10 = vsyncpa [#allocation3], 0  ;;  %s612_s0 = inlined_call_operand.hbm [shape: bf16[16,32], index: 0, kind: input, shape index: {}]   ;;  %s613_s1 = inlined_call_operand.hbm [shape: bf16[32,64], index: 1, kind: input, shape index: {}]   ;;  %s614_s2 = inlined_call_operand.hbm [shape: f32[1,64], index: 2, kind: input, shape index: {}]   ;;  %s615_s3 = inlined_call_operand.hbm [shape: bf16[64,32], index: 3, kind: input, shape index: {}]   ;;  %s616_s4 = inlined_call_operand.hbm [shape: f32[1,32], index: 4, kind: input, shape index: {}]   ;;  %s617_s5 = inlined_call_operand.hbm [shape: f32[16,32], index: 5, kind: output, shape index: {}]  }
   0x1   :  { %11 = vsyncpa [#allocation6], 0 }
   0x2   :  { %12 = vsyncpa [#allocation9], 0 }
   0x3   :  { %13 = vsyncpa [#allocation4], 0  ;;  %s479_s18 = smov [#allocation5]   ;;  %s480_s20 = smov [#allocation8]  }
   0x4   :  { %s31_s19 = sshll.u32 %s479_s18, 4  ;;  %s53_s21 = sshll.u32 %s480_s20, 4  ;;  %s32_s19 = int_to_ptr.vmem [resolvable:$true] %s31_s19  ;;  %s521_s21 = int_to_ptr.vmem [resolvable:$true] %s53_s21 }
   0x5   :  { %s339_s24 = scalar_lea.hbm %s613_s1, 256 }
   0x6   :  { %p340_p0 = scmp.ne.s32.totalorder %s613_s1, %s339_s24  ;;  %p343_p1 = scmp.lt.u32.totalorder %s339_s24, %s613_s1 }
   0x8   :  { %p345_p2 = pnand %p343_p1, %p340_p0 }
   0xa   :  { %348 = shalt.err (!%p345_p2)
}
   0xb   :  { %s349_s29 = scalar_lea.vmem %s32_s19, 256  ;;  %p354_p4 = scmp.lt.s32.totalorder %s32_s19, %s32_s19 }
   0xc   :  { %p350_p3 = scmp.ne.s32.totalorder %s32_s19, %s349_s29  ;;  %p355_p5 = scmp.lt.s32.totalorder %s349_s29, %s349_s29 }
   0xe   :  { %p356_p6 = por %p355_p5, %p354_p4 }
  0x10   :  { %p357_p7 = pnand %p356_p6, %p350_p3 }
  0x12   :  { %360 = shalt.err (!%p357_p7)
}
  0x13   :  { %s481_s30 = smov 64   ;;  %s482_s6 = smov 4  }
  0x14   :  { %37 = dma.hbm_to_vmem [thread:$0]  %s613_s1, 256, %s32_s19, [#allocation6], %s481_s30, %s481_s30, %s482_s6  }
  0x15   :  { %s361_s11 = scalar_lea.hbm %s615_s3, 512 }
  0x16   :  { %p362_p8 = scmp.ne.s32.totalorder %s615_s3, %s361_s11  ;;  %p365_p9 = scmp.lt.u32.totalorder %s361_s11, %s615_s3 }
  0x18   :  { %p367_p10 = pnand %p365_p9, %p362_p8 }
  0x1a   :  { %370 = shalt.err (!%p367_p10)
}
  0x1b   :  { %s371_s16 = scalar_lea.vmem %s521_s21, 512  ;;  %p376_p12 = scmp.lt.s32.totalorder %s521_s21, %s521_s21 }
  0x1c   :  { %p372_p11 = scmp.ne.s32.totalorder %s521_s21, %s371_s16  ;;  %p377_p13 = scmp.lt.s32.totalorder %s371_s16, %s371_s16 }
  0x1e   :  { %p378_p0 = por %p377_p13, %p376_p12 }
  0x20   :  { %p379_p1 = pnand %p378_p0, %p372_p11 }
  0x22   :  { %382 = shalt.err (!%p379_p1)
}
  0x23   :  { %59 = dma.hbm_to_vmem [thread:$0]  %s615_s3, 512, %s521_s21, [#allocation9], %s481_s30, %s481_s30, %s482_s6  }
  0x24   :  { %s483_s18 = smov [#allocation2]   ;;  %s484_s20 = smov [#allocation7]  }
  0x25   :  { %s19_s19 = sshll.u32 %s483_s18, 4  ;;  %s44_s22 = sshll.u32 %s484_s20, 4  ;;  %s20_s19 = int_to_ptr.vmem [resolvable:$true] %s19_s19  ;;  %s45_s22 = int_to_ptr.vmem [resolvable:$true] %s44_s22 }
  0x26   :  { %s383_s25 = scalar_lea.hbm %s612_s0, 128 }
  0x27   :  { %p384_p2 = scmp.ne.s32.totalorder %s612_s0, %s383_s25  ;;  %p387_p3 = scmp.lt.u32.totalorder %s383_s25, %s612_s0 }
  0x29   :  { %p389_p4 = pnand %p387_p3, %p384_p2 }
  0x2b   :  { %392 = shalt.err (!%p389_p4)
}
  0x2c   :  { %s393_s3 = scalar_lea.vmem %s20_s19, 128  ;;  %p398_p6 = scmp.lt.s32.totalorder %s20_s19, %s20_s19 }
  0x2d   :  { %p394_p5 = scmp.ne.s32.totalorder %s20_s19, %s393_s3  ;;  %p399_p7 = scmp.lt.s32.totalorder %s393_s3, %s393_s3 }
  0x2f   :  { %p400_p8 = por %p399_p7, %p398_p6 }
  0x31   :  { %p401_p9 = pnand %p400_p8, %p394_p5 }
  0x33   :  { %404 = shalt.err (!%p401_p9)
}
  0x34   :  { %25 = dma.hbm_to_vmem [thread:$0]  %s612_s0, 128, %s20_s19, [#allocation3], %s481_s30, %s481_s30, %s482_s6  }
  0x35   :  { %s405_s10 = scalar_lea.hbm %s614_s2, 16 }
  0x36   :  { %p406_p10 = scmp.ne.s32.totalorder %s614_s2, %s405_s10  ;;  %p409_p11 = scmp.lt.u32.totalorder %s405_s10, %s614_s2 }
  0x38   :  { %p411_p12 = pnand %p409_p11, %p406_p10 }
  0x3a   :  { %414 = shalt.err (!%p411_p12)
}
  0x3b   :  { %s415_s15 = scalar_lea.vmem %s45_s22, 16  ;;  %s419_s16 = scalar_lea.vmem %s45_s22, 32 }
  0x3c   :  { %p416_p13 = scmp.ne.s32.totalorder %s45_s22, %s415_s15  ;;  %p420_p0 = scmp.lt.s32.totalorder %s45_s22, %s45_s22 }
  0x3d   :  { %p421_p1 = scmp.lt.s32.totalorder %s419_s16, %s415_s15 }
  0x3f   :  { %p422_p2 = por %p421_p1, %p420_p0 }
  0x41   :  { %p423_p3 = pnand %p422_p2, %p416_p13 }
  0x43   :  { %426 = shalt.err (!%p423_p3)
}
  0x44   :  { %47 = dma.hbm_to_vmem [thread:$0]  %s614_s2, 16, %s45_s22, [#allocation6]  }
  0x45   :  { %s485_s6 = smov [#allocation10]   ;;  %s427_s19 = scalar_lea.hbm %s616_s4, 16 }
  0x46   :  { %s66_s1 = sshll.u32 %s485_s6, 4  ;;  %p428_p4 = scmp.ne.s32.totalorder %s616_s4, %s427_s19  ;;  %s67_s1 = int_to_ptr.vmem [resolvable:$true] %s66_s1 }
  0x47   :  { %p431_p5 = scmp.lt.u32.totalorder %s427_s19, %s616_s4 }
  0x49   :  { %p433_p6 = pnand %p431_p5, %p428_p4 }
  0x4b   :  { %436 = shalt.err (!%p433_p6)
}
  0x4c   :  { %s437_s26 = scalar_lea.vmem %s67_s1, 16  ;;  %s441_s2 = scalar_lea.vmem %s67_s1, 32 }
  0x4d   :  { %p438_p7 = scmp.ne.s32.totalorder %s67_s1, %s437_s26  ;;  %p442_p8 = scmp.lt.s32.totalorder %s67_s1, %s67_s1 }
  0x4e   :  { %p443_p9 = scmp.lt.s32.totalorder %s441_s2, %s437_s26 }
  0x50   :  { %p444_p10 = por %p443_p9, %p442_p8 }
  0x52   :  { %p445_p11 = pnand %p444_p10, %p438_p7 }
  0x54   :  { %448 = shalt.err (!%p445_p11)
}
  0x55   :  { %69 = dma.hbm_to_vmem [thread:$0]  %s616_s4, 16, %s67_s1, [#allocation9]  }
  0x56   :  { %471 = dma.done.wait [#allocation3], 128  }
  0x57   :  { %472 = vsyncadd [#allocation3], 4294967168 }
  0x58   :  { %473 = dma.done.wait [#allocation6], 272  }
  0x59   :  { %474 = vsyncadd [#allocation6], 4294967024 }
  0x5a   :  { %475 = dma.done.wait [#allocation9], 528  }
  0x5b   :  { %476 = vsyncadd [#allocation9], 4294966768  ;;  %v486_v0 = vmov 0.0   ;;  %vm487_vm0 = vmmov 0   ;;  %v328_v1 = vld [vmem:[#allocation5] sm:$0xff]   ;;  %v329_v2 = vld [vmem:[#allocation5 + $0x8] sm:$0xff]  }
  0x5c   :  { %296 = vmatprep.subr.bf16.mxu0 %v486_v0  ;;  %300 = vmatprep.mubr.msk.bf16.mxu0 %vm487_vm0, %v486_v0  ;;  %v330_v3 = vld [vmem:[#allocation2] sm:$0xff]   ;;  %vm116_vm1 = vcmask 261120   ;;  %v333_v6 = vld [vmem:[#allocation8 + $0x10] sm:$0xff]   ;;  %v334_v7 = vld [vmem:[#allocation8 + $0x18] sm:$0xff]   ;;  %vm211_vm2 = vcmask 523264   ;;  %s488_s4 = smov [#allocation11]  }
  0x5d   :  { %304 = vmatprep.subr.bf16.mxu1 %v486_v0  ;;  %312 = vmatprep.mubr.msk.bf16.mxu1 %vm487_vm0, %v486_v0  ;;  %v331_v4 = vld [vmem:[#allocation8] sm:$0xff]   ;;  %v332_v5 = vld [vmem:[#allocation8 + $0x8] sm:$0xff]   ;;  %v277_v8 = vld [vmem:[#allocation7] ss:$0 sm:$0xff]  ;;  %s263_s28 = sshll.u32 %s488_s4, 4  ;;  %s264_s28 = int_to_ptr.vmem [resolvable:$true] %s263_s28 }
  0x5e   :  { %297 = vmatpush3.bf16.msra.mxu0 %v328_v1  ;;  %305 = vmatpush3.bf16.msra.mxu1 %v331_v4  ;;  %v282_v26 = vld [vmem:[#allocation10] ss:$0 sm:$0xff]  ;;  %s449_s29 = scalar_lea.vmem %s264_s28, 256  ;;  %p454_p13 = scmp.lt.s32.totalorder %s264_s28, %s264_s28 }
  0x5f   :  { %298 = vmatprep.subr.bf16.mxu0 %v486_v0  ;;  %306 = vmatprep.subr.bf16.mxu1 %v486_v0  ;;  %p450_p12 = scmp.ne.s32.totalorder %s264_s28, %s449_s29  ;;  %p455_p0 = scmp.lt.s32.totalorder %s449_s29, %s449_s29 }
  0x61   :  { %p456_p1 = por %p455_p0, %p454_p13 }
  0x62   :  { %299 = vmatpush3.bf16.msra.mxu0 %v329_v2  ;;  %307 = vmatpush3.bf16.msra.mxu1 %v332_v5 }
  0x63   :  { %308 = vmatprep.subr.bf16.mxu1 %v486_v0  ;;  %p457_p2 = pnand %p456_p1, %p450_p12 }
  0x65   :  { %301 = vmatmul.mubr.msk.bf16.vlgmr.msra.gmra.mrb[0].mxu0 %vm116_vm1, %v330_v3 }
  0x66   :  { %309 = vmatpush3.bf16.msra.mxu1 %v333_v6 }
  0x67   :  { %310 = vmatprep.subr.bf16.mxu1 %v486_v0 }
  0x6a   :  { %311 = vmatpush3.bf16.msra.mxu1 %v334_v7 }
 0x138   :  { %v154_v9 = vpop.f32.mrb[0].mxu0 }
 0x139   :  { %v155_v10 = vadd.f32 %v277_v8, %v154_v9  ;;  %v302_v11 = vpop.f32.mrb[1].mxu0 }
 0x13a   :  { %v157_v12 = vpop.f32.mrb[2].mxu0 }
 0x13b   :  { %v163_v13 = vmul.f32 0.70710677, %v155_v10  ;;  %v158_v14 = vadd.f32 %v277_v8, %v157_v12  ;;  %v303_v15 = vpop.f32.mrb[3].mxu0  ;;  %v161_v20 = vmul.f32 0.5, %v155_v10 }
 0x13d   :  { %335 = verf.f32 %v163_v13  ;;  %v164_v16 = vmul.f32 0.70710677, %v158_v14  ;;  %v162_v21 = vmul.f32 0.5, %v158_v14 }
 0x13f   :  { %337 = verf.f32 %v164_v16 }
 0x147   :  { %v336_v17 = vpop.eup %335 }
 0x148   :  { %v167_v18 = vadd.f32 1.0, %v336_v17 }
 0x149   :  { %v338_v19 = vpop.eup %337 }
 0x14a   :  { %v168_v22 = vadd.f32 1.0, %v338_v19  ;;  %v169_v23 = vmul.f32 %v167_v18, %v161_v20 }
 0x14c   :  { %v170_v24 = vmul.f32 %v168_v22, %v162_v21 }
 0x14e   :  { %v171_v25 = vpack.c.bf16 %v170_v24, %v169_v23 }
 0x150   :  { %313 = vmatmul.mubr.msk.bf16.vlgmr.msra.gmra.mrb[0].mxu1 %vm211_vm2, %v171_v25 }
 0x223   :  { %v249_v27 = vpop.f32.mrb[0].mxu1 }
 0x224   :  { %v250_v28 = vadd.f32 %v282_v26, %v249_v27  ;;  %v314_v29 = vpop.f32.mrb[1].mxu1 }
 0x225   :  { %v252_v30 = vpop.f32.mrb[2].mxu1 }
 0x226   :  { %256 = vst.msk [vmem:[#allocation11] sm:$0xff] %vm116_vm1, %v250_v28  ;;  %v253_v31 = vadd.f32 %v282_v26, %v252_v30  ;;  %v315_v32 = vpop.f32.mrb[3].mxu1 }
 0x228   :  { %257 = vst.msk [vmem:[#allocation11 + $0x8] sm:$0xff] %vm116_vm1, %v253_v31 }
 0x229   :  { %460 = shalt.err (!%p457_p2)
}
 0x22a   :  { %s461_s7 = scalar_lea.hbm %s617_s5, 256 }
 0x22b   :  { %p462_p3 = scmp.ne.s32.totalorder %s617_s5, %s461_s7  ;;  %p465_p4 = scmp.lt.u32.totalorder %s461_s7, %s617_s5 }
 0x22d   :  { %p467_p5 = pnand %p465_p4, %p462_p3 }
 0x22f   :  { %470 = shalt.err (!%p467_p5)
}
 0x230   :  { %s489_s12 = smov 128   ;;  %s490_s13 = smov 8  }
 0x231   :  { %269 = dma.vmem_to_hbm [thread:$0]  %s264_s28, 256, %s617_s5, [#allocation4], %s489_s12, %s489_s12, %s490_s13  }
 0x232   :  { %477 = dma.done.wait [#allocation4], 256  }
 0x233   :  { %478 = vsyncadd [#allocation4], 4294967040 }
 0x234   :  { %273 = vsyncpa [#allocation3], 1 }
 0x235   :  { %274 = vsyncpa [#allocation6], 1 }
 0x236   :  { %275 = vsyncpa [#allocation9], 1 }
 0x237   :  { %276 = vsyncpa [#allocation4], 1 }

</bundles_post_ra>
